<compile_context>
chip_gen: v7x
topology: tpu7x:2x2x1
jax: 0.10.0
libtpu: 0.0.40
codegen_flags: <defaults>
</compile_context>

<pallas_src>
import math
from functools import partial

import jax
import jax.numpy as jnp
from jax.experimental import pallas as pl
from jax.experimental.pallas import tpu as pltpu

_INV_SQRT2 = 1.0 / math.sqrt(2.0)


def _erf(x):
    # Abramowitz & Stegun 7.1.26 polynomial (max abs err ~1.5e-7), built from
    # VPU/EUP-friendly ops.  The divide is an EUP approx reciprocal refined with
    # one Newton step so accuracy stays at ~f32 level.
    a1, a2, a3, a4, a5 = 0.254829592, -0.284496736, 1.421413741, -1.453152027, 1.061405429
    p = 0.3275911
    ax = jnp.abs(x)
    den = 1.0 + p * ax
    t = pl.reciprocal(den, approx=True)     # EUP slot (otherwise idle)
    t = t * (2.0 - den * t)                 # Newton step: error ~(2^-12)^2
    poly = ((((a5 * t + a4) * t + a3) * t + a2) * t + a1) * t
    y = 1.0 - poly * jnp.exp(-ax * ax)
    return jnp.where(x >= 0.0, y, -y)


def _gelu_exact(x):
    # PyTorch nn.GELU() default (approximate='none'): 0.5*x*(1+erf(x/sqrt(2)))
    return 0.5 * x * (1.0 + _erf(x * _INV_SQRT2))


def _cnn1d_kernel(w_ref, prm_ref, x_ref, o_ref, stats_ref, *, eps, count):
    # w_ref:     (K, Cout, Cin)  f32  conv weight, k-major (leading-dim slices)
    # prm_ref:   (2, Cout, 1)    f32  [gamma, beta]
    # x_ref:     (1, Cin, L)     f32  one input sample
    # o_ref:     (1, Cout, Lout) f32  one output sample, NCL layout
    # stats_ref: (2, Cout, 1)    f32  phase 0: [sum, sumsq] -> then [scale, shift]
    phase = pl.program_id(0)
    n = pl.program_id(1)
    n_last = pl.num_programs(1) - 1

    K, Cout, _ = w_ref.shape
    Lout = o_ref.shape[2]

    # ---- Conv1d (valid, stride 1), bias-free: K accumulated MXU matmuls ----
    # (bias cancels exactly under the training-mode BatchNorm that follows)
    x = x_ref[0]                                            # (Cin, L)
    y = jnp.zeros((Cout, Lout), jnp.float32)
    for k in range(K):                                      # K small & static -> unrolled
        y = y + jnp.dot(w_ref[k], x[:, k:k + Lout],
                        preferred_element_type=jnp.float32)

    # ---- Phase 0: one-pass per-channel sum / sumsq accumulation ----
    @pl.when(phase == 0)
    def _():
        @pl.when(n == 0)
        def _():
            stats_ref[...] = jnp.zeros_like(stats_ref)

        stats_ref[0] += jnp.sum(y, axis=1, keepdims=True)
        stats_ref[1] += jnp.sum(y * y, axis=1, keepdims=True)

        # Fold stats + BN affine into one per-channel scale/shift (done once).
        @pl.when(n == n_last)
        def _():
            inv_cnt = 1.0 / count
            mean = stats_ref[0] * inv_cnt
            var = stats_ref[1] * inv_cnt - mean * mean      # biased var (training mode)
            scale = prm_ref[0] * jax.lax.rsqrt(var + eps)   # gamma / sqrt(var+eps)
            stats_ref[1] = prm_ref[1] - mean * scale        # shift = beta - mean*scale
            stats_ref[0] = scale

    # ---- Phase 1: folded BatchNorm affine + exact GELU, store in NCL layout ----
    @pl.when(phase == 1)
    def _():
        z = y * stats_ref[0] + stats_ref[1]
        o_ref[0] = _gelu_exact(z)


def cnn1d_forward(x, w, b, gamma, beta, eps=1e-5):
    """x: (N, Cin, L) f32; w: (Cout, Cin, K); b/gamma/beta: (Cout,).

    `b` is accepted for API parity with nn.Conv1d but is intentionally unused:
    a per-channel constant added before training-mode BatchNorm cancels exactly
    in the forward output (verified against the biased reference in __main__).
    """
    del b
    N, Cin, L = x.shape
    Cout, _, K = w.shape
    Lout = L - K + 1

    x = x.astype(jnp.float32)
    w_t = jnp.transpose(w, (2, 0, 1)).astype(jnp.float32)           # (K, Cout, Cin)
    prm = jnp.stack([gamma, beta]).reshape(2, Cout, 1).astype(jnp.float32)

    # Advisory cost estimate: conv recomputed in both phases, GELU/BN epilogue,
    # x read twice (two-phase), output written once.
    flops = 2 * (2 * N * Lout * Cout * Cin * K) + 25 * N * Cout * Lout
    cost = pl.CostEstimate(
        flops=int(flops),
        transcendentals=int(2 * N * Cout * Lout),
        bytes_accessed=int(2 * x.size * 4 + w_t.size * 4 + prm.size * 4
                           + N * Cout * Lout * 4),
    )

    out = pl.pallas_call(
        partial(_cnn1d_kernel, eps=float(eps), count=float(N * Lout)),
        out_shape=jax.ShapeDtypeStruct((N, Cout, Lout), jnp.float32),
        grid_spec=pltpu.PrefetchScalarGridSpec(
            num_scalar_prefetch=0,
            grid=(2, N),                                            # (phase, sample)
            in_specs=[
                pl.BlockSpec((K, Cout, Cin), lambda p, n: (0, 0, 0)),   # weights (resident)
                pl.BlockSpec((2, Cout, 1), lambda p, n: (0, 0, 0)),     # gamma/beta
                pl.BlockSpec((1, Cin, L), lambda p, n: (n, 0, 0)),      # x sample
            ],
            out_specs=pl.BlockSpec((1, Cout, Lout), lambda p, n: (n, 0, 0)),
            scratch_shapes=[pltpu.VMEM((2, Cout, 1), jnp.float32)],     # persistent BN stats
        ),
        compiler_params=pltpu.CompilerParams(
            # Both axes carry the BN stat dependency (phase->apply, sample accumulation).
            dimension_semantics=("arbitrary", "arbitrary"),
            vmem_limit_bytes=32 * 1024 * 1024,
        ),
        cost_estimate=cost,
    )(w_t, prm, x)
    return out


def _reference(x, w, b, gamma, beta, eps=1e-5):
    # Pure-JAX reference of the PyTorch forward (training-mode BatchNorm), WITH bias.
    y = jax.lax.conv_general_dilated(
        x, w, window_strides=(1,), padding="VALID",
        dimension_numbers=("NCH", "OIH", "NCH"))
    y = y + b[None, :, None]
    mean = jnp.mean(y, axis=(0, 2), keepdims=True)
    var = jnp.var(y, axis=(0, 2), keepdims=True)
    yn = (y - mean) / jnp.sqrt(var + eps)
    yn = yn * gamma[None, :, None] + beta[None, :, None]
    return 0.5 * yn * (1.0 + jax.scipy.special.erf(yn / math.sqrt(2.0)))


if __name__ == "__main__":
    # Module config: CNN1d(in_channels=4, out_channel=8, kernel_size=3)
    N, Cin, Cout, K, L = 2, 4, 8, 3, 16

    key = jax.random.PRNGKey(0)
    kw, kb, kx = jax.random.split(key, 3)

    # Deterministic PyTorch-style Conv1d init: U(-1/sqrt(Cin*K), 1/sqrt(Cin*K))
    bound = 1.0 / math.sqrt(Cin * K)
    w = jax.random.uniform(kw, (Cout, Cin, K), jnp.float32, -bound, bound)
    b = jax.random.uniform(kb, (Cout,), jnp.float32, -bound, bound)
    gamma = jnp.ones((Cout,), jnp.float32)   # BatchNorm1d affine init
    beta = jnp.zeros((Cout,), jnp.float32)

    x = jax.random.normal(kx, (N, Cin, L), jnp.float32)

    out = jax.block_until_ready(cnn1d_forward(x, w, b, gamma, beta))

    ref = _reference(x, w, b, gamma, beta)
    assert out.shape == (N, Cout, L - K + 1), out.shape
    err = float(jnp.max(jnp.abs(out - ref)))
    assert jnp.allclose(out, ref, atol=1e-5, rtol=1e-5), err

    print("KERNEL_OK")
</pallas_src>

<mosaic_0001>
module attributes {stable_mosaic.version = 11 : i64} {
  func.func @_cnn1d_kernel(%arg0: i32, %arg1: i32, %arg2: memref<3x8x4xf32, #tpu.memory_space<vmem>>, %arg3: memref<2x8x1xf32, #tpu.memory_space<vmem>>, %arg4: memref<1x4x16xf32, #tpu.memory_space<vmem>>, %arg5: memref<1x8x14xf32, #tpu.memory_space<vmem>>, %arg6: memref<2x8x1xf32, #tpu.memory_space<vmem>>) attributes {dimension_semantics = [#tpu.dimension_semantics<arbitrary>, #tpu.dimension_semantics<arbitrary>], iteration_bounds = array<i64: 2, 2>, scalar_prefetch = 0 : i64, scratch_operands = 1 : i64, tpu.core_type = #tpu.core_type<tc>, window_params = [{pipeline_mode = #tpu.pipeline_mode<synchronous>, transform_indices = @transform_0, window_bounds = array<i64: 3, 8, 4>}, {pipeline_mode = #tpu.pipeline_mode<synchronous>, transform_indices = @transform_1, window_bounds = array<i64: 2, 8, 1>}, {transform_indices = @transform_2, window_bounds = array<i64: 1, 4, 16>}, {transform_indices = @transform_3, window_bounds = array<i64: 1, 8, 14>}]} {
    %c0 = arith.constant 0 : index
    %c0_0 = arith.constant 0 : index
    %c0_1 = arith.constant 0 : index
    %0 = vector.load %arg4[%c0, %c0_0, %c0_1] : memref<1x4x16xf32, #tpu.memory_space<vmem>>, vector<1x4x16xf32>
    %1 = vector.shape_cast %0 : vector<1x4x16xf32> to vector<4x16xf32>
    %cst = arith.constant 0.000000e+00 : f32
    %2 = vector.broadcast %cst : f32 to vector<8x14xf32>
    %c0_2 = arith.constant 0 : index
    %c0_3 = arith.constant 0 : index
    %c0_4 = arith.constant 0 : index
    %3 = vector.load %arg2[%c0_2, %c0_3, %c0_4] : memref<3x8x4xf32, #tpu.memory_space<vmem>>, vector<1x8x4xf32>
    %4 = vector.shape_cast %3 : vector<1x8x4xf32> to vector<8x4xf32>
    %5 = vector.extract_strided_slice %1 {offsets = [0, 0], sizes = [4, 14], strides = [1, 1]} : vector<4x16xf32> to vector<4x14xf32>
    %cst_5 = arith.constant dense<0.000000e+00> : vector<8x14xf32>
    %6 = tpu.matmul %4, %5, %cst_5 {dimension_numbers = #tpu.dot_dimension_numbers<[1], [0], [0], [1], [0, 0, 1, 1], [], []>} : vector<8x4xf32>, vector<4x14xf32>, vector<8x14xf32> -> vector<8x14xf32>
    %7 = arith.addf %2, %6 : vector<8x14xf32>
    %c1 = arith.constant 1 : index
    %c0_6 = arith.constant 0 : index
    %c0_7 = arith.constant 0 : index
    %8 = vector.load %arg2[%c1, %c0_6, %c0_7] : memref<3x8x4xf32, #tpu.memory_space<vmem>>, vector<1x8x4xf32>
    %9 = vector.shape_cast %8 : vector<1x8x4xf32> to vector<8x4xf32>
    %10 = vector.extract_strided_slice %1 {offsets = [0, 1], sizes = [4, 14], strides = [1, 1]} : vector<4x16xf32> to vector<4x14xf32>
    %cst_8 = arith.constant dense<0.000000e+00> : vector<8x14xf32>
    %11 = tpu.matmul %9, %10, %cst_8 {dimension_numbers = #tpu.dot_dimension_numbers<[1], [0], [0], [1], [0, 0, 1, 1], [], []>} : vector<8x4xf32>, vector<4x14xf32>, vector<8x14xf32> -> vector<8x14xf32>
    %12 = arith.addf %7, %11 : vector<8x14xf32>
    %c2 = arith.constant 2 : index
    %c0_9 = arith.constant 0 : index
    %c0_10 = arith.constant 0 : index
    %13 = vector.load %arg2[%c2, %c0_9, %c0_10] : memref<3x8x4xf32, #tpu.memory_space<vmem>>, vector<1x8x4xf32>
    %14 = vector.shape_cast %13 : vector<1x8x4xf32> to vector<8x4xf32>
    %15 = vector.extract_strided_slice %1 {offsets = [0, 2], sizes = [4, 14], strides = [1, 1]} : vector<4x16xf32> to vector<4x14xf32>
    %cst_11 = arith.constant dense<0.000000e+00> : vector<8x14xf32>
    %16 = tpu.matmul %14, %15, %cst_11 {dimension_numbers = #tpu.dot_dimension_numbers<[1], [0], [0], [1], [0, 0, 1, 1], [], []>} : vector<8x4xf32>, vector<4x14xf32>, vector<8x14xf32> -> vector<8x14xf32>
    %17 = arith.addf %12, %16 : vector<8x14xf32>
    %c0_i32 = arith.constant 0 : i32
    %18 = arith.cmpi eq, %arg0, %c0_i32 : i32
    %19 = arith.extui %18 : i1 to i32
    %c0_i32_12 = arith.constant 0 : i32
    %20 = arith.cmpi ne, %19, %c0_i32_12 : i32
    scf.if %20 {
      %c0_i32_14 = arith.constant 0 : i32
      %24 = arith.cmpi eq, %arg1, %c0_i32_14 : i32
      %25 = arith.extui %24 : i1 to i32
      %c0_i32_15 = arith.constant 0 : i32
      %26 = arith.cmpi ne, %25, %c0_i32_15 : i32
      scf.if %26 {
        %cst_32 = arith.constant 0.000000e+00 : f32
        %47 = vector.broadcast %cst_32 : f32 to vector<2x8x1xf32>
        %c0_33 = arith.constant 0 : index
        %c0_34 = arith.constant 0 : index
        %c0_35 = arith.constant 0 : index
        %48 = vector.load %arg6[%c0_33, %c0_34, %c0_35] : memref<2x8x1xf32, #tpu.memory_space<vmem>>, vector<2x8x1xf32>
        tpu.vector_store %arg6[%c0_33, %c0_34, %c0_35], %47 {strides = array<i32>} : memref<2x8x1xf32, #tpu.memory_space<vmem>>, vector<2x8x1xf32>,
      } else {
      }
      %c0_16 = arith.constant 0 : index
      %c0_17 = arith.constant 0 : index
      %c0_18 = arith.constant 0 : index
      %27 = vector.load %arg6[%c0_16, %c0_17, %c0_18] : memref<2x8x1xf32, #tpu.memory_space<vmem>>, vector<1x8x1xf32>
      %28 = vector.shape_cast %27 : vector<1x8x1xf32> to vector<8x1xf32>
      %cst_19 = arith.constant dense<0.000000e+00> : vector<8xf32>
      %29 = vector.multi_reduction <add>, %17, %cst_19 [1] : vector<8x14xf32> to vector<8xf32>
      %30 = vector.shape_cast %29 : vector<8xf32> to vector<8x1xf32>
      %31 = arith.addf %28, %30 : vector<8x1xf32>
      %c0_20 = arith.constant 0 : index
      %c0_21 = arith.constant 0 : index
      %c0_22 = arith.constant 0 : index
      %32 = vector.load %arg6[%c0_20, %c0_21, %c0_22] : memref<2x8x1xf32, #tpu.memory_space<vmem>>, vector<1x8x1xf32>
      %33 = vector.shape_cast %32 : vector<1x8x1xf32> to vector<8x1xf32>
      %34 = vector.shape_cast %31 : vector<8x1xf32> to vector<1x8x1xf32>
      tpu.vector_store %arg6[%c0_20, %c0_21, %c0_22], %34 {strides = array<i32>} : memref<2x8x1xf32, #tpu.memory_space<vmem>>, vector<1x8x1xf32>,
      %c1_23 = arith.constant 1 : index
      %c0_24 = arith.constant 0 : index
      %c0_25 = arith.constant 0 : index
      %35 = vector.load %arg6[%c1_23, %c0_24, %c0_25] : memref<2x8x1xf32, #tpu.memory_space<vmem>>, vector<1x8x1xf32>
      %36 = vector.shape_cast %35 : vector<1x8x1xf32> to vector<8x1xf32>
      %37 = arith.mulf %17, %17 : vector<8x14xf32>
      %cst_26 = arith.constant dense<0.000000e+00> : vector<8xf32>
      %38 = vector.multi_reduction <add>, %37, %cst_26 [1] : vector<8x14xf32> to vector<8xf32>
      %39 = vector.shape_cast %38 : vector<8xf32> to vector<8x1xf32>
      %40 = arith.addf %36, %39 : vector<8x1xf32>
      %c1_27 = arith.constant 1 : index
      %c0_28 = arith.constant 0 : index
      %c0_29 = arith.constant 0 : index
      %41 = vector.load %arg6[%c1_27, %c0_28, %c0_29] : memref<2x8x1xf32, #tpu.memory_space<vmem>>, vector<1x8x1xf32>
      %42 = vector.shape_cast %41 : vector<1x8x1xf32> to vector<8x1xf32>
      %43 = vector.shape_cast %40 : vector<8x1xf32> to vector<1x8x1xf32>
      tpu.vector_store %arg6[%c1_27, %c0_28, %c0_29], %43 {strides = array<i32>} : memref<2x8x1xf32, #tpu.memory_space<vmem>>, vector<1x8x1xf32>,
      %c1_i32_30 = arith.constant 1 : i32
      %44 = arith.cmpi eq, %arg1, %c1_i32_30 : i32
      %45 = arith.extui %44 : i1 to i32
      %c0_i32_31 = arith.constant 0 : i32
      %46 = arith.cmpi ne, %45, %c0_i32_31 : i32
      scf.if %46 {
        %c0_32 = arith.constant 0 : index
        %c0_33 = arith.constant 0 : index
        %c0_34 = arith.constant 0 : index
        %47 = vector.load %arg6[%c0_32, %c0_33, %c0_34] : memref<2x8x1xf32, #tpu.memory_space<vmem>>, vector<1x8x1xf32>
        %48 = vector.shape_cast %47 : vector<1x8x1xf32> to vector<8x1xf32>
        %cst_35 = arith.constant 0.0357142873 : f32
        %49 = vector.broadcast %cst_35 : f32 to vector<8x1xf32>
        %50 = arith.mulf %48, %49 : vector<8x1xf32>
        %c1_36 = arith.constant 1 : index
        %c0_37 = arith.constant 0 : index
        %c0_38 = arith.constant 0 : index
        %51 = vector.load %arg6[%c1_36, %c0_37, %c0_38] : memref<2x8x1xf32, #tpu.memory_space<vmem>>, vector<1x8x1xf32>
        %52 = vector.shape_cast %51 : vector<1x8x1xf32> to vector<8x1xf32>
        %cst_39 = arith.constant 0.0357142873 : f32
        %53 = vector.broadcast %cst_39 : f32 to vector<8x1xf32>
        %54 = arith.mulf %52, %53 : vector<8x1xf32>
        %55 = arith.mulf %50, %50 : vector<8x1xf32>
        %56 = arith.subf %54, %55 : vector<8x1xf32>
        %c0_40 = arith.constant 0 : index
        %c0_41 = arith.constant 0 : index
        %c0_42 = arith.constant 0 : index
        %57 = vector.load %arg3[%c0_40, %c0_41, %c0_42] : memref<2x8x1xf32, #tpu.memory_space<vmem>>, vector<1x8x1xf32>
        %58 = vector.shape_cast %57 : vector<1x8x1xf32> to vector<8x1xf32>
        %cst_43 = arith.constant 9.99999974E-6 : f32
        %59 = vector.broadcast %cst_43 : f32 to vector<8x1xf32>
        %60 = arith.addf %56, %59 : vector<8x1xf32>
        %61 = math.rsqrt %60 : vector<8x1xf32>
        %62 = arith.mulf %58, %61 : vector<8x1xf32>
        %c1_44 = arith.constant 1 : index
        %c0_45 = arith.constant 0 : index
        %c0_46 = arith.constant 0 : index
        %63 = vector.load %arg3[%c1_44, %c0_45, %c0_46] : memref<2x8x1xf32, #tpu.memory_space<vmem>>, vector<1x8x1xf32>
        %64 = vector.shape_cast %63 : vector<1x8x1xf32> to vector<8x1xf32>
        %65 = arith.mulf %50, %62 : vector<8x1xf32>
        %66 = arith.subf %64, %65 : vector<8x1xf32>
        %c1_47 = arith.constant 1 : index
        %c0_48 = arith.constant 0 : index
        %c0_49 = arith.constant 0 : index
        %67 = vector.load %arg6[%c1_47, %c0_48, %c0_49] : memref<2x8x1xf32, #tpu.memory_space<vmem>>, vector<1x8x1xf32>
        %68 = vector.shape_cast %67 : vector<1x8x1xf32> to vector<8x1xf32>
        %69 = vector.shape_cast %66 : vector<8x1xf32> to vector<1x8x1xf32>
        tpu.vector_store %arg6[%c1_47, %c0_48, %c0_49], %69 {strides = array<i32>} : memref<2x8x1xf32, #tpu.memory_space<vmem>>, vector<1x8x1xf32>,
        %c0_50 = arith.constant 0 : index
        %c0_51 = arith.constant 0 : index
        %c0_52 = arith.constant 0 : index
        %70 = vector.load %arg6[%c0_50, %c0_51, %c0_52] : memref<2x8x1xf32, #tpu.memory_space<vmem>>, vector<1x8x1xf32>
        %71 = vector.shape_cast %70 : vector<1x8x1xf32> to vector<8x1xf32>
        %72 = vector.shape_cast %62 : vector<8x1xf32> to vector<1x8x1xf32>
        tpu.vector_store %arg6[%c0_50, %c0_51, %c0_52], %72 {strides = array<i32>} : memref<2x8x1xf32, #tpu.memory_space<vmem>>, vector<1x8x1xf32>,
      } else {
      }
    } else {
    }
    %c1_i32 = arith.constant 1 : i32
    %21 = arith.cmpi eq, %arg0, %c1_i32 : i32
    %22 = arith.extui %21 : i1 to i32
    %c0_i32_13 = arith.constant 0 : i32
    %23 = arith.cmpi ne, %22, %c0_i32_13 : i32
    scf.if %23 {
      %c0_14 = arith.constant 0 : index
      %c0_15 = arith.constant 0 : index
      %c0_16 = arith.constant 0 : index
      %24 = vector.load %arg6[%c0_14, %c0_15, %c0_16] : memref<2x8x1xf32, #tpu.memory_space<vmem>>, vector<1x8x1xf32>
      %25 = vector.shape_cast %24 : vector<1x8x1xf32> to vector<8x1xf32>
      %26 = vector.broadcast %25 : vector<8x1xf32> to vector<8x14xf32>
      %27 = arith.mulf %17, %26 : vector<8x14xf32>
      %c1_17 = arith.constant 1 : index
      %c0_18 = arith.constant 0 : index
      %c0_19 = arith.constant 0 : index
      %28 = vector.load %arg6[%c1_17, %c0_18, %c0_19] : memref<2x8x1xf32, #tpu.memory_space<vmem>>, vector<1x8x1xf32>
      %29 = vector.shape_cast %28 : vector<1x8x1xf32> to vector<8x1xf32>
      %30 = vector.broadcast %29 : vector<8x1xf32> to vector<8x14xf32>
      %31 = arith.addf %27, %30 : vector<8x14xf32>
      %cst_20 = arith.constant 5.000000e-01 : f32
      %32 = vector.broadcast %cst_20 : f32 to vector<8x14xf32>
      %33 = arith.mulf %32, %31 : vector<8x14xf32>
      %cst_21 = arith.constant 0.707106769 : f32
      %34 = vector.broadcast %cst_21 : f32 to vector<8x14xf32>
      %35 = arith.mulf %31, %34 : vector<8x14xf32>
      %36 = math.absf %35 : vector<8x14xf32>
      %cst_22 = arith.constant 0.327591091 : f32
      %37 = vector.broadcast %cst_22 : f32 to vector<8x14xf32>
      %38 = arith.mulf %37, %36 : vector<8x14xf32>
      %cst_23 = arith.constant 1.000000e+00 : f32
      %39 = vector.broadcast %cst_23 : f32 to vector<8x14xf32>
      %40 = arith.addf %39, %38 : vector<8x14xf32>
      %41 = tpu.reciprocal %40 {approx = true} : vector<8x14xf32> -> vector<8x14xf32>
      %42 = arith.mulf %40, %41 : vector<8x14xf32>
      %cst_24 = arith.constant 2.000000e+00 : f32
      %43 = vector.broadcast %cst_24 : f32 to vector<8x14xf32>
      %44 = arith.subf %43, %42 : vector<8x14xf32>
      %45 = arith.mulf %41, %44 : vector<8x14xf32>
      %cst_25 = arith.constant 1.06140542 : f32
      %46 = vector.broadcast %cst_25 : f32 to vector<8x14xf32>
      %47 = arith.mulf %46, %45 : vector<8x14xf32>
      %cst_26 = arith.constant -1.45315206 : f32
      %48 = vector.broadcast %cst_26 : f32 to vector<8x14xf32>
      %49 = arith.addf %47, %48 : vector<8x14xf32>
      %50 = arith.mulf %49, %45 : vector<8x14xf32>
      %cst_27 = arith.constant 1.42141378 : f32
      %51 = vector.broadcast %cst_27 : f32 to vector<8x14xf32>
      %52 = arith.addf %50, %51 : vector<8x14xf32>
      %53 = arith.mulf %52, %45 : vector<8x14xf32>
      %cst_28 = arith.constant -0.284496725 : f32
      %54 = vector.broadcast %cst_28 : f32 to vector<8x14xf32>
      %55 = arith.addf %53, %54 : vector<8x14xf32>
      %56 = arith.mulf %55, %45 : vector<8x14xf32>
      %cst_29 = arith.constant 0.254829586 : f32
      %57 = vector.broadcast %cst_29 : f32 to vector<8x14xf32>
      %58 = arith.addf %56, %57 : vector<8x14xf32>
      %59 = arith.mulf %58, %45 : vector<8x14xf32>
      %cst_30 = arith.constant 0.000000e+00 : f32
      %60 = vector.broadcast %cst_30 : f32 to vector<8x14xf32>
      %61 = arith.subf %60, %36 : vector<8x14xf32>
      %62 = arith.mulf %61, %36 : vector<8x14xf32>
      %63 = math.exp %62 : vector<8x14xf32>
      %64 = arith.mulf %59, %63 : vector<8x14xf32>
      %cst_31 = arith.constant 1.000000e+00 : f32
      %65 = vector.broadcast %cst_31 : f32 to vector<8x14xf32>
      %66 = arith.subf %65, %64 : vector<8x14xf32>
      %cst_32 = arith.constant 0.000000e+00 : f32
      %67 = vector.broadcast %cst_32 : f32 to vector<8x14xf32>
      %68 = arith.cmpf oge, %35, %67 : vector<8x14xf32>
      %cst_33 = arith.constant 0.000000e+00 : f32
      %69 = vector.broadcast %cst_33 : f32 to vector<8x14xf32>
      %70 = arith.subf %69, %66 : vector<8x14xf32>
      %71 = arith.select %68, %66, %70 : vector<8x14xi1>, vector<8x14xf32>
      %cst_34 = arith.constant 1.000000e+00 : f32
      %72 = vector.broadcast %cst_34 : f32 to vector<8x14xf32>
      %73 = arith.addf %72, %71 : vector<8x14xf32>
      %74 = arith.mulf %33, %73 : vector<8x14xf32>
      %c0_35 = arith.constant 0 : index
      %c0_36 = arith.constant 0 : index
      %c0_37 = arith.constant 0 : index
      %75 = vector.load %arg5[%c0_35, %c0_36, %c0_37] : memref<1x8x14xf32, #tpu.memory_space<vmem>>, vector<1x8x14xf32>
      %76 = vector.shape_cast %75 : vector<1x8x14xf32> to vector<8x14xf32>
      %77 = vector.shape_cast %74 : vector<8x14xf32> to vector<1x8x14xf32>
      tpu.vector_store %arg5[%c0_35, %c0_36, %c0_37], %77 {strides = array<i32>} : memref<1x8x14xf32, #tpu.memory_space<vmem>>, vector<1x8x14xf32>,
    } else {
    }
    return
  }
  func.func @transform_0(%arg0: i32, %arg1: i32) -> (i32, i32, i32) {
    %c0_i32 = arith.constant 0 : i32
    %c0_i32_0 = arith.constant 0 : i32
    %c0_i32_1 = arith.constant 0 : i32
    %c0_i32_2 = arith.constant 0 : i32
    return %c0_i32, %c0_i32_0, %c0_i32_1 : i32, i32, i32
  }
  func.func @transform_1(%arg0: i32, %arg1: i32) -> (i32, i32, i32) {
    %c0_i32 = arith.constant 0 : i32
    %c0_i32_0 = arith.constant 0 : i32
    %c0_i32_1 = arith.constant 0 : i32
    %c0_i32_2 = arith.constant 0 : i32
    return %c0_i32, %c0_i32_0, %c0_i32_1 : i32, i32, i32
  }
  func.func @transform_2(%arg0: i32, %arg1: i32) -> (i32, i32, i32) {
    %c0_i32 = arith.constant 0 : i32
    %c0_i32_0 = arith.constant 0 : i32
    %c0_i32_1 = arith.constant 0 : i32
    return %arg1, %c0_i32, %c0_i32_0 : i32, i32, i32
  }
  func.func @transform_3(%arg0: i32, %arg1: i32) -> (i32, i32, i32) {
    %c0_i32 = arith.constant 0 : i32
    %c0_i32_0 = arith.constant 0 : i32
    %c0_i32_1 = arith.constant 0 : i32
    return %arg1, %c0_i32, %c0_i32_0 : i32, i32, i32
  }
}

</mosaic_0001>

<bundles_post_ra>
// kernel: tpu_custom_call.1
= control target key start
LH: loop header
LB: loop body
LE: loop exit
PB: predicated region body
PF: predicated region fallthrough
CT: control target
= control target key end

     0   :  { %8 = vsyncpa [#allocation4], 0  ;;  %s1022_s0 = inlined_call_operand.vmem [shape: f32[3,8,4], index: 0, kind: input, shape index: {}]   ;;  %s1023_s1 = inlined_call_operand.vmem [shape: f32[2,8,1], index: 1, kind: input, shape index: {}]   ;;  %s1024_s2 = inlined_call_operand.vmem [shape: f32[2,4,16], index: 2, kind: input, shape index: {}]   ;;  %s1025_s3 = inlined_call_operand.hbm [shape: f32[2,8,14], index: 3, kind: output, shape index: {}]  }
   0x1   :  { %10 = vsyncpa [#allocation4 + $0x1], 0  ;;  %s853_s12 = smov 0   ;;  %s855_s13 = smov 0  }
   0x2   :  { %s857_s14 = smov 0   ;;  %s859_s15 = smov 0  }
   0x3   :  { %s861_s16 = smov 0   ;;  %s863_s17 = smov 0  }
   0x4   :  { %s865_s18 = smov 0   ;;  %s867_s19 = smov 0  }
   0x5 LB: > { %s598_s20 = sadd.s32 4294967295, %s824_s19   ;;  %s599_s21 = sadd.s32 4294967294, %s824_s19   ;;  %s824_s19 = sphi %s867_s19, %s16_s19   ;;  %s820_s18 = sphi %s865_s18, %s1034_s18   ;;  %s816_s17 = sphi %s863_s17, %s1033_s17   ;;  %s812_s16 = sphi %s861_s16, %s1032_s16   ;;  %s808_s15 = sphi %s859_s15, %s1031_s15   ;;  %s804_s14 = sphi %s857_s14, %s1030_s14   ;;  %s800_s13 = sphi %s855_s13, %s1029_s13   ;;  %s796_s12 = sphi %s853_s12, %s1028_s12  }
   0x6   : > { %s25_s22 = sadd.s32 1, %s816_s17  ;;  %s28_s23 = sadd.s32 1, %s820_s18 }
   0x7   : > { %p26_p0 = scmp.ge.s32.totalorder %s25_s22, 2  ;;  %s103_s24 = sadd.s32 1, %s804_s14 }
   0x8   : > { %p113_p1 = scmp.ne.s32.totalorder %s804_s14, %s800_s13  ;;  %p114_p2 = scmp.eq.s32.totalorder %s598_s20, 3 }
   0x9   : > { %s1036_s22 = smov (%p26_p0, %s25_s22), 0  ;;  %s1038_s23 = smov (!%p26_p0, %s28_s23), %s820_s18 }
   0xa   : > { %s100_s25 = ssub.s32 %s816_s17, %s1036_s22  ;;  %p905_p3 = por %p114_p2, %p113_p1 }
   0xb   : > { %p30_p4 = scmp.ge.s32.totalorder %s1038_s23, 2  ;;  %p101_p5 = scmp.eq.s32.totalorder %s100_s25, 0 }
   0xc   : > { %p119_p6 = scmp.ne.s32.totalorder %s800_s13, %s796_s12  ;;  %p120_p7 = scmp.eq.s32.totalorder %s599_s21, 3 }
   0xd   : > { %s1040_s23 = smov (%p30_p4, %s1038_s23), 0  ;;  %p602_p9 = scmp.ge.s32.totalorder %s824_s19, 1 }
   0xe   : > { %s914_s27 = scalar_select %p101_p5, %s804_s14, %s103_s24  }
   0xf   : > { %p916_p8 = por %p120_p7, %p119_p6  ;;  %p151_p10 = scmp.lt.s32.totalorder %s824_s19, 5 }
  0x11   : > { %p152_p11 = pnand %p602_p9, %p151_p10 }
  0x12   : > { %p174_p12 = scmp.lt.s32.totalorder (!%p152_p11), %s808_s15, 1  ;;  %v826_v0 = vmov (!%p152_p11), 0.0   ;;  %vm827_vm0 = vmmov (!%p152_p11), 0   ;;  %s171_s29 = sand.u32 (!%p152_p11), 1, %s800_s13   ;;  %vm189_vm1 = vcmask (!%p152_p11), 1043456   ;;  %v179_v1 = vld [vmem:[%s1022_s0] sm:$0xff] (!%p152_p11) }
  0x13   : > { %155 = sbr.rel (%p152_p11) target bundleno = 769 (0x301), region = 32  ;;  %633 = vmatprep.subr.mxu0 (!%p152_p11), %v826_v0  ;;  %635 = vmatprep.mubr.msk.f32.mxu0 (!%p152_p11), %vm827_vm0, %v826_v0  ;;  %s929_s4 = sshll.u32 (!%p152_p11), %s171_s29, 3  ;;  %vm185_vm2 = vcmask (!%p152_p11), 31744   ;;  %v605_v3 = vld [vmem:[%s1022_s0 + $0x8] sm:$0xff] (!%p152_p11)  ;;  %v610_v5 = vld [vmem:[%s1022_s0 + $0x10] sm:$0xff] (!%p152_p11) }
  0x14   : > { %628 = vmatprep.subr.mxu1 (!%p152_p11), %v826_v0  ;;  %630 = vmatprep.mubr.msk.f32.mxu1 (!%p152_p11), %vm827_vm0, %v826_v0  ;;  %s828_s11 = smov (!%p152_p11), 127   ;;  %s829_s20 = smov (!%p152_p11), 126  }
  0x15   : > { %p613_p13 = scmp.ne.s32.totalorder (!%p152_p11), %s812_s16, 0 }
  0x1a   : > { %s175_s30 = scalar_select %p174_p12, %s808_s15, 1 }
  0x1b   : > { %p614_p0 = scmp.ne.s32.totalorder (!%p613_p13), %s808_s15, 0 }
  0x1c   : > { %s604_s5 = sshll.u32 %s175_s30, 2 }
  0x1d   : > { %s177_s8 = scalar_lea.vmem %s1024_s2, %s604_s5  ;;  %s173_s5 = scalar_lea.vmem [#allocation3], %s929_s4 }
  0x1e   : > { %v178_v2 = vld [vmem:[%s177_s8] sm:$0xf] }
  0x1f   : > { %183 = vrot.lane.b32.xlu0 %v178_v2, %s828_s11  ;;  %634 = vmatpush3.msk.msra.mxu0 %vm189_vm1, %v178_v2 }
  0x20   : > { %636 = vmatmul.mubr.msk.f32.vlgmr.msra.gmra.mrb[0].mxu0 %vm185_vm2, %v179_v1  ;;  %638 = vmatprep.subr.mxu0 %v826_v0 }
  0x21   : > { %640 = vmatprep.mubr.msk.f32.mxu0 %vm827_vm0, %v826_v0 }
  0x23   : > { %339 = vrot.lane.b32.xlu0 %v178_v2, %s829_s20 }
  0x91   : > { %v184_v4 = vpop.permute.xlu0 %183 }
  0x92   : > { %629 = vmatpush3.msk.msra.mxu1 %vm189_vm1, %v184_v4 }
  0x93   : > { %631 = vmatmul.mubr.msk.f32.vlgmr.msra.gmra.mrb[0].mxu1 %vm185_vm2, %v605_v3 }
  0x95   : > { %v340_v6 = vpop.permute.xlu0 %339 }
  0x96   : > { %639 = vmatpush3.msk.msra.mxu0 %vm189_vm1, %v340_v6 }
  0x97   : > { %641 = vmatmul.mubr.msk.f32.vlgmr.msra.gmra.mrb[0].mxu0 %vm185_vm2, %v610_v5 }
 0x165   : > { %420 = sbr.rel (%p613_p13) target bundleno = 553 (0x229), region = 36 }
 0x166   : > { %v258_v7 = vpop.f32.mrb[0].mxu1 }
 0x167   : > { %v632_v8 = vpop.f32.mrb[1].mxu1 }
 0x16a   : > { %v412_v9 = vpop.f32.mrb[0].mxu0 }
 0x16b   : > { %v643_v10 = vadd.f32 %v412_v9, %v258_v7  ;;  %v642_v11 = vpop.f32.mrb[1].mxu0 }
 0x16c   : > { %424 = sbr.rel (%p614_p0) target bundleno = 371 (0x173), region = 40  ;;  %vm425_vm3 = vcmask (!%p614_p0), 7168   ;;  %v830_v12 = vmov (!%p614_p0), 0.0  }
 0x16d   : > { %426 = vst.msk [vmem:[#allocation2] sm:$0xff] (!%p614_p0), %vm425_vm3, %v830_v12  ;;  %427 = vst.msk [vmem:[#allocation2 + $0x8] sm:$0xff] (!%p614_p0), %vm425_vm3, %v830_v12 }
 0x173 PF: > { %vm429_vm4 = vcmask 113664   ;;  %v438_v13 = vmul.f32 %v643_v10, %v643_v10  ;;  %vm434_vm5 = vcmask 7168   ;;  %p615_p1 = scmp.ne.s32.totalorder %s808_s15, 1 }
 0x174   : > { %v430_v14 = vsel %vm429_vm4, %v643_v10, 0.0  ;;  %v428_v16 = vld [vmem:[#allocation2] sm:$0xff]  ;;  %v437_v19 = vld [vmem:[#allocation2 + $0x8] sm:$0xff] }
 0x175   : > { %431 = vadd.xlane.f32.xlu0 %v430_v14  ;;  %v439_v15 = vsel %vm429_vm4, %v438_v13, 0.0  ;;  %v454_v29 = vld [vmem:[%s1023_s1] sm:$0xff] (!%p615_p1)  ;;  %v616_v32 = vld [vmem:[%s1023_s1 + $0x8] sm:$0xff] (!%p615_p1) }
 0x179   : > { %440 = vadd.xlane.f32.xlu0 %v439_v15 }
 0x202   : > { %v432_v17 = vpop.xlane.xlu0 %431 }
 0x203   : > { %v433_v18 = vadd.f32 %v432_v17, %v428_v16  ;;  %447 = sbr.rel (%p615_p1) target bundleno = 553 (0x229), region = 44 }
 0x205   : > { %435 = vst.msk [vmem:[#allocation2] sm:$0xff] %vm434_vm5, %v433_v18 }
 0x206   : > { %v441_v20 = vpop.xlane.xlu0 %440 }
 0x207   : > { %v442_v21 = vadd.f32 %v441_v20, %v437_v19 }
 0x209   : > { %443 = vst.msk [vmem:[#allocation2 + $0x8] sm:$0xff] %vm434_vm5, %v442_v21 }
 0x20c   : > { %v448_v22 = vld [vmem:[#allocation2] sm:$0xff] }
 0x20d   : > { %v449_v24 = vmul.f32 0.035714287, %v448_v22 }
 0x20f   : > { %v452_v26 = vmul.f32 %v449_v24, %v449_v24 }
 0x210   : > { %v450_v23 = vld [vmem:[#allocation2 + $0x8] sm:$0xff] }
 0x211   : > { %v451_v25 = vmul.f32 0.035714287, %v450_v23 }
 0x213   : > { %v453_v27 = vsub.f32 %v451_v25, %v452_v26 }
 0x215   : > { %v455_v28 = vadd.f32 1e-05, %v453_v27 }
 0x217   : > { %723 = vrsqrt.f32 %v455_v28 }
 0x221   : > { %v724_v30 = vpop.eup %723 }
 0x222   : > { %v457_v31 = vmul.f32 %v724_v30, %v454_v29 }
 0x224   : > { %v460_v33 = vmul.f32 %v457_v31, %v449_v24  ;;  %463 = vst.msk [vmem:[#allocation2] sm:$0xff] %vm434_vm5, %v457_v31 }
 0x226   : > { %v461_v34 = vsub.f32 %v616_v32, %v460_v33 }
 0x228   : > { %462 = vst.msk [vmem:[#allocation2 + $0x8] sm:$0xff] %vm434_vm5, %v461_v34 }
 0x229 PF: > { %p617_p2 = scmp.ne.s32.totalorder %s812_s16, 1 }
 0x22a   : > { %v831_v36 = vmov (!%p617_p2), 0   ;;  %vm512_vm7 = vcmask (!%p617_p2), 113664  }
 0x22b   : > { %467 = sbr.rel (%p617_p2) target bundleno = 745 (0x2e9), region = 48  ;;  %v468_v35 = vld [vmem:[#allocation2] sm:$0xff] (!%p617_p2)  ;;  %725 = vset.pattern.permute.xlu0 (!%p617_p2), %v831_v36 }
 0x22c   : > { %471 = vperm.xlu0 (!%p617_p2), %725, %v468_v35  }
 0x22f   : > { %v476_v37 = vld [vmem:[#allocation2 + $0x8] sm:$0xff] (!%p617_p2) }
 0x230   : > { %479 = vperm.xlu0 (!%p617_p2), %725, %v476_v37  }
 0x2ab   : > { %v472_v38 = vpop.permute.xlu0 %471 }
 0x2ac   : > { %v474_v39 = vmul.f32 %v643_v10, %v472_v38 }
 0x2af   : > { %v480_v40 = vpop.permute.xlu0 %479 }
 0x2b0   : > { %v482_v41 = vadd.f32 %v480_v40, %v474_v39 }
 0x2b2   : > { %v484_v42 = vmul.f32 0.70710677, %v482_v41  ;;  %v483_v3 = vmul.f32 0.5, %v482_v41 }
 0x2b4   : > { %v485_v43 = vand.u32 2147483647, %v484_v42  ;;  %vm507_vm6 = vcmp.ge.f32.partialorder %v484_v42, 0.0 }
 0x2b6   : > { %v486_v44 = vmul.f32 0.3275911, %v485_v43  ;;  %v501_v48 = vsub.f32 0.0, %v485_v43 }
 0x2b8   : > { %v487_v45 = vadd.f32 1.0, %v486_v44  ;;  %v502_v51 = vmul.f32 %v501_v48, %v485_v43 }
 0x2ba   : > { %726 = vrcp.f32 %v487_v45  ;;  %v503_v54 = vmul.f32 1.442695, %v502_v51 }
 0x2bc   : > { %728 = vpow2.f32 %v503_v54 }
 0x2c4   : > { %v727_v46 = vpop.eup %726 }
 0x2c5   : > { %v489_v47 = vmul.f32 %v727_v46, %v487_v45 }
 0x2c6   : > { %v729_v62 = vpop.eup %728 }
 0x2c7   : > { %v490_v49 = vsub.f32 2.0, %v489_v47 }
 0x2c9   : > { %v491_v50 = vmul.f32 %v727_v46, %v490_v49 }
 0x2cb   : > { %v492_v52 = vmul.f32 1.0614054, %v491_v50 }
 0x2cd   : > { %v493_v53 = vadd.f32 -1.4531521, %v492_v52 }
 0x2cf   : > { %v494_v55 = vmul.f32 %v493_v53, %v491_v50 }
 0x2d1   : > { %v495_v56 = vadd.f32 1.4214138, %v494_v55 }
 0x2d3   : > { %v496_v57 = vmul.f32 %v495_v56, %v491_v50 }
 0x2d5   : > { %v497_v58 = vadd.f32 -0.28449672, %v496_v57 }
 0x2d7   : > { %v498_v59 = vmul.f32 %v497_v58, %v491_v50 }
 0x2d9   : > { %v499_v60 = vadd.f32 0.2548296, %v498_v59 }
 0x2db   : > { %v500_v61 = vmul.f32 %v499_v60, %v491_v50 }
 0x2dd   : > { %v505_v63 = vmul.f32 %v729_v62, %v500_v61 }
 0x2df   : > { %v506_v0 = vsub.f32 1.0, %v505_v63 }
 0x2e1   : > { %v508_v1 = vsub.f32 0.0, %v506_v0 }
 0x2e3   : > { %v509_v2 = vsel %vm507_vm6, %v506_v0, %v508_v1 }
 0x2e4   : > { %v510_v4 = vadd.f32 1.0, %v509_v2 }
 0x2e6   : > { %v511_v5 = vmul.f32 %v510_v4, %v483_v3 }
 0x2e8   : > { %513 = vst.msk [vmem:[%s173_s5] sm:$0xff] %vm512_vm7, %v511_v5 }
 0x2e9 PF: > { %s619_s16 = sshll.u32 %s808_s15, 7  ;;  %s528_s21 = sshll.u32 %s173_s5, 4  ;;  %s529_s21 = int_to_ptr.vmem [resolvable:$true] %s528_s21 }
 0x2ea   : > { %s971_s20 = scalar_lea.hbm %s1025_s3, %s619_s16  ;;  %s515_s24 = scalar_lea.sflag [#allocation4], %s171_s29 }
 0x2eb   : > { %s730_s25 = scalar_lea.vmem %s529_s21, 128  ;;  %s832_s30 = smov [#allocation3]  }
 0x2ec   : > { %p731_p4 = scmp.ne.s32.totalorder %s529_s21, %s730_s25  ;;  %s734_s6 = sshll.u32 %s832_s30, 4  ;;  %s735_s6 = int_to_ptr.vmem [resolvable:$false] %s734_s6 }
 0x2ed   : > { %s736_s7 = scalar_lea.vmem %s735_s6, 256  ;;  %p737_p7 = scmp.lt.s32.totalorder %s529_s21, %s735_s6 }
 0x2ee   : > { %p732_p5 = pnand %p731_p4, %p905_p3  ;;  %p738_p9 = scmp.lt.s32.totalorder %s736_s7, %s730_s25 }
 0x2f0   : > { %p733_p6 = pneg %p732_p5  ;;  %p739_p10 = por %p738_p9, %p737_p7 }
 0x2f2   : > { %p740_p11 = pnand %p739_p10, %p733_p6 }
 0x2f4   : > { %743 = shalt.err (!%p740_p11)
}
 0x2f5   : > { %s744_s15 = scalar_lea.hbm %s971_s20, 128  ;;  %s748_s5 = scalar_lea.hbm %s1025_s3, 256 }
 0x2f6   : > { %p745_p12 = scmp.ne.s32.totalorder %s971_s20, %s744_s15  ;;  %p749_p1 = scmp.lt.u32.totalorder %s971_s20, %s1025_s3 }
 0x2f7   : > { %p750_p2 = scmp.lt.u32.totalorder %s748_s5, %s744_s15  ;;  %p752_p5 = scmp.lt.u32.totalorder %s744_s15, %s971_s20 }
 0x2f8   : > { %p746_p13 = pnand %p745_p12, %p905_p3 }
 0x2f9   : > { %p751_p4 = por %p750_p2, %p749_p1 }
 0x2fa   : > { %p747_p0 = pneg %p746_p13 }
 0x2fb   : > { %p753_p6 = por %p752_p5, %p751_p4 }
 0x2fd   : > { %p754_p7 = pnand %p753_p6, %p747_p0 }
 0x2ff   : > { %757 = shalt.err (!%p754_p7)
}
 0x300   : > { %646 = dma.vmem_to_hbm [thread:$0]  (%p905_p3), %s529_s21, 128, %s971_s20, %s515_s24  }
 0x301 PF: > { %p652_p9 = scmp.ge.s32.totalorder %s824_s19, 2  ;;  %s540_s16 = sand.u32 1, %s796_s12  }
 0x302   : > { %s541_s10 = scalar_lea.sflag [#allocation4], %s540_s16 }
 0x303   : > { %p649_p10 = pnand %p652_p9, %p916_p8 }
 0x305   : > { %791 = dma.done.wait (!%p649_p10), %s541_s10, 128  }
 0x306   : > { %793 = vsyncadd (!%p649_p10), %s541_s10, 4294967168  ;;  %s16_s19 = sadd.s32 1, %s824_s19   ;;  %s1028_s12 = smov %s800_s13 }
 0x307   : > { %p13_p11 = scmp.ge.s32.totalorder %s16_s19, 6   ;;  %s1029_s13 = smov %s804_s14 }
 0x308   : > { %s1030_s14 = smov %s914_s27  ;;  %s1031_s15 = smov %s816_s17 }
 0x309   : > { %s1032_s16 = smov %s820_s18  ;;  %s1033_s17 = smov %s1036_s22 }
 0x30a   : > { %s1034_s18 = smov %s1040_s23  ;;  %15 = sbr.rel (!%p13_p11) target bundleno = 5 (0x5), region = 88 }
 0x311   :  { %546 = vsyncpa [#allocation4], 1 }
 0x312   :  { %548 = vsyncpa [#allocation4 + $0x1], 1 }

</bundles_post_ra>
